<compile_context>
chip_gen: v7x
topology: tpu7x:2x2x1
jax: 0.10.0
libtpu: 0.0.40
codegen_flags: <defaults>
</compile_context>

<pallas_src>
import functools

import jax
import jax.numpy as jnp
from jax.experimental import pallas as pl
from jax.experimental.pallas import tpu as pltpu


def _round_up(x, m):
    return ((x + m - 1) // m) * m


def _pick_batch_tile(b, bytes_per_image, vmem_budget, cap=32, min_steps=4):
    """Largest batch tile that fits the VMEM budget, capped so that at least
    `min_steps` grid steps remain when the batch allows it (megacore overlap)."""
    fit = max(1, vmem_budget // max(bytes_per_image, 1))
    tb = min(cap, fit, b, max(1, pl.cdiv(b, min_steps)))
    return max(1, int(tb))


def _conv_same_kernel(w_ref, x_ref, o_ref, xbuf, *, kh, kw, hd, wd, tb, hb, wb):
    """SAME-padded kh x kw cross-correlation on a batch tile of tb images.

    w_ref : (kh*kw,) f32 in SMEM       -- flattened conv weight
    x_ref : (tb, hd, wd) f32 in VMEM   -- unpadded downsampled images
    o_ref : (tb, hd, wd) f32 in VMEM   -- exact output block (masked vst)
    xbuf  : (tb, hb, wb) f32 VMEM scratch -- zero-extended lane-dense copy
    """
    pad_h, pad_w = kh // 2, kw // 2
    n_rows = tb * hb

    # Hoist the taps: one SMEM read per weight, outside the MAC loop.
    taps = [w_ref[i] for i in range(kh * kw)]

    # Zero-extend into the lane-dense scratch: valid interior first, then only
    # the two halo rectangles (redone every step -> megacore-safe).
    xbuf[:, 0:hd, 0:wd] = x_ref[...].astype(jnp.float32)
    if hb > hd:
        xbuf[:, hd:hb, :] = jnp.zeros((tb, hb - hd, wb), jnp.float32)
    if wb > wd:
        xbuf[:, 0:hd, wd:wb] = jnp.zeros((tb, hd, wb - wd), jnp.float32)

    # Layout-preserving flat view (hb % 8 == 0, wb % 128 == 0): every roll/MAC
    # below acts on the whole batch tile at once.
    flat = xbuf[...].reshape(n_rows, wb)

    # Column mask only needed when the lane halo is thinner than pad_w
    # (e.g. wd already a multiple of 128).
    need_col_mask = (wb - wd) < pad_w
    if need_col_mask:
        col = jax.lax.broadcasted_iota(jnp.int32, (n_rows, wb), 1)

    # Initialize with the centre tap (no roll, no mask) instead of zeros + add.
    acc = taps[pad_h * kw + pad_w] * flat

    for ky in range(kh):
        rshift = pad_h - ky                       # output row y reads x[y + ky - pad_h]
        rowed = pltpu.roll(flat, rshift % n_rows, 0) if rshift else flat
        for kx in range(kw):
            if ky == pad_h and kx == pad_w:
                continue                          # centre tap already applied
            cshift = pad_w - kx                   # output col x reads x[.., x + kx - pad_w]
            shifted = pltpu.roll(rowed, cshift % wb, 1) if cshift else rowed
            if need_col_mask and cshift > 0:
                shifted = jnp.where(col >= cshift, shifted, 0.0)
            elif need_col_mask and cshift < 0:
                shifted = jnp.where(col < wb + cshift, shifted, 0.0)
            acc = acc + taps[ky * kw + kx] * shifted

    out = acc.reshape(tb, hb, wb)
    o_ref[...] = out[:, 0:hd, 0:wd].astype(o_ref.dtype)


def conv2d_1ch_pallas(x, weight_flat, kh, kw):
    """x: (B, Hd, Wd) f32. Returns (B, Hd, Wd) SAME-padded k x k conv (no bias)."""
    assert kh % 2 == 1 and kw % 2 == 1, (
        "roll-based SAME padding assumes odd kernel_size (PyTorch Conv2d with "
        "even k and padding=k//2 changes the output size)")
    b, hd, wd = x.shape
    pad_h, pad_w = kh // 2, kw // 2

    # Lane-dense working tile: sublane dim rounded to 8 with >= pad_h zero rows;
    # lane dim rounded to 128 only (thin lane halos are masked in-kernel).
    hb = _round_up(max(hd + pad_h, 8), 8)
    wb = _round_up(max(wd, 128), 128)

    try:
        vmem_cap = int(pltpu.get_tpu_info().vmem_capacity_bytes)
    except Exception:
        vmem_cap = 64 << 20   # conservative (v7x-sized) fallback

    # Per-image VMEM bytes: double-buffered in/out blocks + scratch + ~5
    # tile-sized compiler temporaries (acc / rowed / shifted / selects).
    bytes_per_image = 4 * (4 * hd * wd + 6 * hb * wb)
    tb = _pick_batch_tile(b, bytes_per_image, int(vmem_cap * 0.55))

    # Non-divisor batches: zero-pad the batch instead of collapsing to tb = 1.
    bp = pl.cdiv(b, tb) * tb
    if bp != b:
        x = jnp.concatenate([x, jnp.zeros((bp - b, hd, wd), x.dtype)], axis=0)

    vmem_limit = int(min(max(int(1.25 * tb * bytes_per_image), 32 << 20),
                         int(vmem_cap * 0.72)))

    kernel = functools.partial(_conv_same_kernel, kh=kh, kw=kw, hd=hd, wd=wd,
                               tb=tb, hb=hb, wb=wb)
    out = pl.pallas_call(
        kernel,
        out_shape=jax.ShapeDtypeStruct((bp, hd, wd), jnp.float32),
        grid_spec=pltpu.PrefetchScalarGridSpec(
            num_scalar_prefetch=0,
            grid=(bp // tb,),
            in_specs=[
                pl.BlockSpec(memory_space=pltpu.MemorySpace.SMEM),  # conv taps
                pl.BlockSpec((tb, hd, wd), lambda i: (i, 0, 0)),    # images
            ],
            out_specs=pl.BlockSpec((tb, hd, wd), lambda i: (i, 0, 0)),
            scratch_shapes=[pltpu.VMEM((tb, hb, wb), jnp.float32)],
        ),
        compiler_params=pltpu.CompilerParams(
            dimension_semantics=("parallel",),
            vmem_limit_bytes=vmem_limit),
    )(weight_flat, x)
    return out if bp == b else out[:b]


class DegradationKernelPallas:
    def __init__(self, kernel_size=3, scale_factor=2, key=jax.random.PRNGKey(42)):
        self.kernel_size = kernel_size
        self.scale_factor = scale_factor
        # nn.Conv2d default init (kaiming-uniform): fan_in = in_ch * k * k = k*k.
        fan_in = kernel_size * kernel_size
        bound = 1.0 / float(fan_in) ** 0.5
        self.weight = jax.random.uniform(
            key, (kernel_size, kernel_size), jnp.float32, -bound, bound)

    def random_downsample(self, hr_data, key):
        """hr_data: (B, C, H, W). Sorted random row/col subsampling.

        Single fused gather -> no (B, C, Hd, W) intermediate HBM round-trip.
        """
        _, _, h, w = hr_data.shape
        sf = self.scale_factor
        if float(sf) == int(sf):
            dh, dw = h // int(sf), w // int(sf)      # integer path (no fp edge cases)
        else:
            dh, dw = int(h / sf), int(w / sf)        # matches PyTorch int(h / sf)
        kh_key, kw_key = jax.random.split(key)
        idx_h = jnp.sort(jax.random.permutation(kh_key, h)[:dh])
        idx_w = jnp.sort(jax.random.permutation(kw_key, w)[:dw])
        return hr_data[:, :, idx_h[:, None], idx_w[None, :]]

    def __call__(self, hr_data, key=jax.random.PRNGKey(1)):
        # hr_data: (B, 1, H, W) float32 (Conv2d(1,1) requires a single channel).
        ds = self.random_downsample(hr_data, key)        # (B, 1, Hd, Wd)
        b, c, hd, wd = ds.shape
        assert c == 1, "DegradationKernel conv expects a single channel"
        x = ds[:, 0, :, :].astype(jnp.float32)           # (B, Hd, Wd)
        out = conv2d_1ch_pallas(
            x, self.weight.reshape(-1), kh=self.kernel_size, kw=self.kernel_size)
        return out[:, None, :, :]                        # (B, 1, Hd, Wd) NCHW


def _reference_conv(ds, weight):
    """Pure-JAX reference (NCHW, 1->1 channel, SAME padding, cross-correlation)."""
    return jax.lax.conv_general_dilated(
        ds, weight[None, None, :, :], window_strides=(1, 1),
        padding="SAME", dimension_numbers=("NCHW", "OIHW", "NCHW"))


if __name__ == "__main__":
    key = jax.random.PRNGKey(0)
    x_key, ds_key = jax.random.split(key)

    # Small shapes consistent with the module: batch=2, channel=1, spatial=16.
    hr = jax.random.normal(x_key, (2, 1, 16, 16), jnp.float32)

    model = DegradationKernelPallas(kernel_size=3, scale_factor=2)
    out = model(hr, key=ds_key)
    out = jax.block_until_ready(out)

    # Sanity check vs pure-JAX conv on the same downsampled data.
    ds = model.random_downsample(hr, ds_key)
    ref = _reference_conv(ds, model.weight)
    assert out.shape == (2, 1, 8, 8), out.shape
    assert jnp.allclose(out, ref, atol=1e-5, rtol=1e-5), float(
        jnp.max(jnp.abs(out - ref)))

    print("KERNEL_OK")
</pallas_src>

<mosaic_0001>
module attributes {stable_mosaic.version = 11 : i64} {
  func.func @_conv_same_kernel(%arg0: i32, %arg1: memref<9xf32, #tpu.memory_space<smem>>, %arg2: memref<1x8x8xf32, #tpu.memory_space<vmem>>, %arg3: memref<1x8x8xf32, #tpu.memory_space<vmem>>, %arg4: memref<1x16x128xf32, #tpu.memory_space<vmem>>) attributes {dimension_semantics = [#tpu.dimension_semantics<parallel>], iteration_bounds = array<i64: 2>, scalar_prefetch = 0 : i64, scratch_operands = 1 : i64, tpu.core_type = #tpu.core_type<tc>, window_params = [{transform_indices = @transform_0, window_bounds = array<i64: 9>}, {transform_indices = @transform_1, window_bounds = array<i64: 1, 8, 8>}, {transform_indices = @transform_2, window_bounds = array<i64: 1, 8, 8>}]} {
    %c0 = arith.constant 0 : index
    %0 = memref.load %arg1[%c0] : memref<9xf32, #tpu.memory_space<smem>>
    %c1 = arith.constant 1 : index
    %1 = memref.load %arg1[%c1] : memref<9xf32, #tpu.memory_space<smem>>
    %c2 = arith.constant 2 : index
    %2 = memref.load %arg1[%c2] : memref<9xf32, #tpu.memory_space<smem>>
    %c3 = arith.constant 3 : index
    %3 = memref.load %arg1[%c3] : memref<9xf32, #tpu.memory_space<smem>>
    %c4 = arith.constant 4 : index
    %4 = memref.load %arg1[%c4] : memref<9xf32, #tpu.memory_space<smem>>
    %c5 = arith.constant 5 : index
    %5 = memref.load %arg1[%c5] : memref<9xf32, #tpu.memory_space<smem>>
    %c6 = arith.constant 6 : index
    %6 = memref.load %arg1[%c6] : memref<9xf32, #tpu.memory_space<smem>>
    %c7 = arith.constant 7 : index
    %7 = memref.load %arg1[%c7] : memref<9xf32, #tpu.memory_space<smem>>
    %c8 = arith.constant 8 : index
    %8 = memref.load %arg1[%c8] : memref<9xf32, #tpu.memory_space<smem>>
    %c0_0 = arith.constant 0 : index
    %c0_1 = arith.constant 0 : index
    %c0_2 = arith.constant 0 : index
    %9 = vector.load %arg2[%c0_0, %c0_1, %c0_2] : memref<1x8x8xf32, #tpu.memory_space<vmem>>, vector<1x8x8xf32>
    %c0_3 = arith.constant 0 : index
    %c0_4 = arith.constant 0 : index
    %c0_5 = arith.constant 0 : index
    %10 = vector.load %arg4[%c0_3, %c0_4, %c0_5] : memref<1x16x128xf32, #tpu.memory_space<vmem>>, vector<1x8x8xf32>
    tpu.vector_store %arg4[%c0_3, %c0_4, %c0_5], %9 {strides = array<i32>} : memref<1x16x128xf32, #tpu.memory_space<vmem>>, vector<1x8x8xf32>,
    %cst = arith.constant 0.000000e+00 : f32
    %11 = vector.broadcast %cst : f32 to vector<1x8x128xf32>
    %c0_6 = arith.constant 0 : index
    %c8_7 = arith.constant 8 : index
    %c0_8 = arith.constant 0 : index
    %12 = vector.load %arg4[%c0_6, %c8_7, %c0_8] : memref<1x16x128xf32, #tpu.memory_space<vmem>>, vector<1x8x128xf32>
    tpu.vector_store %arg4[%c0_6, %c8_7, %c0_8], %11 {strides = array<i32>} : memref<1x16x128xf32, #tpu.memory_space<vmem>>, vector<1x8x128xf32>,
    %cst_9 = arith.constant 0.000000e+00 : f32
    %13 = vector.broadcast %cst_9 : f32 to vector<1x8x120xf32>
    %c0_10 = arith.constant 0 : index
    %c0_11 = arith.constant 0 : index
    %c8_12 = arith.constant 8 : index
    %14 = vector.load %arg4[%c0_10, %c0_11, %c8_12] : memref<1x16x128xf32, #tpu.memory_space<vmem>>, vector<1x8x120xf32>
    tpu.vector_store %arg4[%c0_10, %c0_11, %c8_12], %13 {strides = array<i32>} : memref<1x16x128xf32, #tpu.memory_space<vmem>>, vector<1x8x120xf32>,
    %c0_13 = arith.constant 0 : index
    %c0_14 = arith.constant 0 : index
    %c0_15 = arith.constant 0 : index
    %15 = vector.load %arg4[%c0_13, %c0_14, %c0_15] : memref<1x16x128xf32, #tpu.memory_space<vmem>>, vector<1x16x128xf32>
    %16 = vector.shape_cast %15 : vector<1x16x128xf32> to vector<16x128xf32>
    %17 = vector.broadcast %4 : f32 to vector<16x128xf32>
    %18 = arith.mulf %17, %16 : vector<16x128xf32>
    %c1_i32 = arith.constant 1 : i32
    %19 = tpu.dynamic_rotate %16 by %c1_i32 dim 0 : vector<16x128xf32>, i32 -> vector<16x128xf32>
    %c1_i32_16 = arith.constant 1 : i32
    %20 = tpu.dynamic_rotate %19 by %c1_i32_16 dim 1 : vector<16x128xf32>, i32 -> vector<16x128xf32>
    %21 = vector.broadcast %0 : f32 to vector<16x128xf32>
    %22 = arith.mulf %21, %20 : vector<16x128xf32>
    %23 = arith.addf %18, %22 : vector<16x128xf32>
    %24 = vector.broadcast %1 : f32 to vector<16x128xf32>
    %25 = arith.mulf %24, %19 : vector<16x128xf32>
    %26 = arith.addf %23, %25 : vector<16x128xf32>
    %c127_i32 = arith.constant 127 : i32
    %27 = tpu.dynamic_rotate %19 by %c127_i32 dim 1 : vector<16x128xf32>, i32 -> vector<16x128xf32>
    %28 = vector.broadcast %2 : f32 to vector<16x128xf32>
    %29 = arith.mulf %28, %27 : vector<16x128xf32>
    %30 = arith.addf %26, %29 : vector<16x128xf32>
    %c1_i32_17 = arith.constant 1 : i32
    %31 = tpu.dynamic_rotate %16 by %c1_i32_17 dim 1 : vector<16x128xf32>, i32 -> vector<16x128xf32>
    %32 = vector.broadcast %3 : f32 to vector<16x128xf32>
    %33 = arith.mulf %32, %31 : vector<16x128xf32>
    %34 = arith.addf %30, %33 : vector<16x128xf32>
    %c127_i32_18 = arith.constant 127 : i32
    %35 = tpu.dynamic_rotate %16 by %c127_i32_18 dim 1 : vector<16x128xf32>, i32 -> vector<16x128xf32>
    %36 = vector.broadcast %5 : f32 to vector<16x128xf32>
    %37 = arith.mulf %36, %35 : vector<16x128xf32>
    %38 = arith.addf %34, %37 : vector<16x128xf32>
    %c15_i32 = arith.constant 15 : i32
    %39 = tpu.dynamic_rotate %16 by %c15_i32 dim 0 : vector<16x128xf32>, i32 -> vector<16x128xf32>
    %c1_i32_19 = arith.constant 1 : i32
    %40 = tpu.dynamic_rotate %39 by %c1_i32_19 dim 1 : vector<16x128xf32>, i32 -> vector<16x128xf32>
    %41 = vector.broadcast %6 : f32 to vector<16x128xf32>
    %42 = arith.mulf %41, %40 : vector<16x128xf32>
    %43 = arith.addf %38, %42 : vector<16x128xf32>
    %44 = vector.broadcast %7 : f32 to vector<16x128xf32>
    %45 = arith.mulf %44, %39 : vector<16x128xf32>
    %46 = arith.addf %43, %45 : vector<16x128xf32>
    %c127_i32_20 = arith.constant 127 : i32
    %47 = tpu.dynamic_rotate %39 by %c127_i32_20 dim 1 : vector<16x128xf32>, i32 -> vector<16x128xf32>
    %48 = vector.broadcast %8 : f32 to vector<16x128xf32>
    %49 = arith.mulf %48, %47 : vector<16x128xf32>
    %50 = arith.addf %46, %49 : vector<16x128xf32>
    %51 = vector.shape_cast %50 : vector<16x128xf32> to vector<1x16x128xf32>
    %52 = vector.extract_strided_slice %51 {offsets = [0, 0, 0], sizes = [1, 8, 8], strides = [1, 1, 1]} : vector<1x16x128xf32> to vector<1x8x8xf32>
    %c0_21 = arith.constant 0 : index
    %c0_22 = arith.constant 0 : index
    %c0_23 = arith.constant 0 : index
    %53 = vector.load %arg3[%c0_21, %c0_22, %c0_23] : memref<1x8x8xf32, #tpu.memory_space<vmem>>, vector<1x8x8xf32>
    tpu.vector_store %arg3[%c0_21, %c0_22, %c0_23], %52 {strides = array<i32>} : memref<1x8x8xf32, #tpu.memory_space<vmem>>, vector<1x8x8xf32>,
    return
  }
  func.func @transform_0(%arg0: i32) -> i32 {
    %c0_i32 = arith.constant 0 : i32
    %c0_i32_0 = arith.constant 0 : i32
    return %c0_i32 : i32
  }
  func.func @transform_1(%arg0: i32) -> (i32, i32, i32) {
    %c0_i32 = arith.constant 0 : i32
    %c0_i32_0 = arith.constant 0 : i32
    %c0_i32_1 = arith.constant 0 : i32
    return %arg0, %c0_i32, %c0_i32_0 : i32, i32, i32
  }
  func.func @transform_2(%arg0: i32) -> (i32, i32, i32) {
    %c0_i32 = arith.constant 0 : i32
    %c0_i32_0 = arith.constant 0 : i32
    %c0_i32_1 = arith.constant 0 : i32
    return %arg0, %c0_i32, %c0_i32_0 : i32, i32, i32
  }
}

</mosaic_0001>

<bundles_post_ra>
// kernel: tpu_custom_call.1
= control target key start
LH: loop header
LB: loop body
LE: loop exit
PB: predicated region body
PF: predicated region fallthrough
CT: control target
= control target key end

     0   :  { %7 = vsyncpa [#allocation6], 0  ;;  %s762_s0 = inlined_call_operand.hbm [shape: f32[9], index: 0, kind: input, shape index: {}]   ;;  %s763_s1 = inlined_call_operand.hbm [shape: f32[2,8,8], index: 1, kind: input, shape index: {}]   ;;  %s764_s2 = inlined_call_operand.hbm [shape: f32[2,8,8], index: 2, kind: output, shape index: {}]  }
   0x1   :  { %8 = vsyncpa [#allocation4], 0 }
   0x2   :  { %10 = vsyncpa [#allocation4 + $0x1], 0 }
   0x3   :  { %11 = vsyncpa [#allocation5], 0 }
   0x4   :  { %13 = vsyncpa [#allocation5 + $0x1], 0  ;;  %s551_s9 = smov 0   ;;  %s553_s10 = smov 0  }
   0x5   :  { %s555_s11 = smov 0   ;;  %s557_s12 = smov 0  }
   0x6 LB: > { %s572_s13 = sadd.s32 4294967295, %s528_s12   ;;  %s333_s14 = sadd.s32 4294967294, %s528_s12   ;;  %s528_s12 = sphi %s557_s12, %s785_s12   ;;  %s524_s11 = sphi %s555_s11, %s784_s11   ;;  %s520_s10 = sphi %s553_s10, %s783_s10   ;;  %s516_s9 = sphi %s551_s9, %s782_s9  }
   0x7   : > { %p60_p0 = scmp.ne.s32.totalorder %s520_s10, %s516_s9  ;;  %p765_p1 = scmp.eq.s32.totalorder %s572_s13, 0 }
   0x8   : > { %p90_p3 = scmp.eq.s32.totalorder %s333_s14, 1  ;;  %p334_p5 = scmp.ge.s32.totalorder %s528_s12, 1 }
   0x9   : > { %p581_p4 = por %p765_p1, %p60_p0  ;;  %p97_p7 = scmp.lt.s32.totalorder %s528_s12, 3 }
   0xa   : > { %p586_p6 = por %p90_p3, %p60_p0  ;;  %s597_s18 = sadd.s32 1, %s528_s12  }
   0xb   : > { %s768_s15 = scalar_select %p581_p4, 1, 0 }
   0xc   : > { %s769_s16 = scalar_select %p586_p6, 1, 0 }
   0xd   : > { %p591_p8 = pnand %p334_p5, %p97_p7  ;;  %s44_s19 = ssub.s32 %s528_s12, %s597_s18 }
   0xe   : > { %s47_s20 = sadd.s32 1, %s524_s11  ;;  %p610_p12 = scmp.eq.s32.totalorder %s44_s19, 0 }
   0xf   : > { %p363_p10 = pneg %p591_p8  ;;  %p54_p13 = scmp.ne.s32.totalorder %s524_s11, %s520_s10 }
  0x10   : > { %p55_p0 = scmp.eq.s32.totalorder %s528_s12, 0  ;;  %p376_p3 = scmp.lt.s32.totalorder %s528_s12, 2 }
  0x11   : > { %p606_p11 = pnand %p363_p10, %p765_p1  ;;  %s415_s25 = scalar_lea.hbm %s762_s0, 16 }
  0x12   : > { %p416_p5 = scmp.ne.s32.totalorder %s762_s0, %s415_s25  ;;  %p422_p1 = scmp.lt.u32.totalorder %s415_s25, %s762_s0 }
  0x13   : > { %p417_p7 = pneg %p606_p11 }
  0x15   : > { %p418_p10 = pnand %p417_p7, %p416_p5 }
  0x17   : > { %p419_p9 = pneg %p418_p10 }
  0x19   : > { %p424_p2 = pnand %p422_p1, %p419_p9 }
  0x1b   : > { %427 = shalt.err (!%p424_p2)
}
  0x1c   : > { %s530_s30 = smov [#allocation3]   ;;  %p56_p1 = por %p55_p0, %p54_p13 }
  0x1d   : > { %366 = dma.hbm_to_smem (!%p606_p11), %s762_s0, 16, %s530_s30, [#allocation6]  }
  0x1e   : > { %s637_s5 = scalar_select %p610_p12, %s524_s11, %s47_s20  }
  0x1f   : > { %p773_p2 = scmp.eq.s32.totalorder %s572_s13, 1  ;;  %s119_s7 = sand.u32 1, %s524_s11  }
  0x20   : > { %s338_s8 = sshll.u32 %s528_s12, 7  ;;  %s337_s14 = sshll.u32 %s119_s7, 3 }
  0x21   : > { %p649_p9 = por %p773_p2, %p54_p13  ;;  %s658_s23 = scalar_lea.hbm %s763_s1, %s338_s8 }
  0x22   : > { %s123_s20 = scalar_lea.vmem [#allocation7], %s337_s14  ;;  %p662_p11 = pnand %p376_p3, %p56_p1 }
  0x23   : > { %s774_s6 = scalar_select %p649_p9, 1, 0 }
  0x24   : > { %s130_s22 = sshll.u32 %s123_s20, 4  ;;  %s120_s25 = scalar_lea.sflag [#allocation4], %s119_s7  ;;  %s666_s22 = int_to_ptr.vmem [resolvable:$true] %s130_s22 }
  0x25   : > { %s428_s26 = scalar_lea.hbm %s658_s23, 128  ;;  %p430_p13 = pneg %p662_p11 }
  0x26   : > { %p429_p12 = scmp.ne.s32.totalorder %s658_s23, %s428_s26  ;;  %s433_s29 = scalar_lea.hbm %s763_s1, 256 }
  0x27   : > { %p434_p3 = scmp.lt.u32.totalorder %s658_s23, %s763_s1  ;;  %p435_p7 = scmp.lt.u32.totalorder %s433_s29, %s428_s26 }
  0x28   : > { %p431_p0 = pnand %p430_p13, %p429_p12  ;;  %p437_p1 = scmp.lt.u32.totalorder %s428_s26, %s658_s23 }
  0x29   : > { %p436_p10 = por %p435_p7, %p434_p3 }
  0x2a   : > { %p432_p5 = pneg %p431_p0 }
  0x2b   : > { %p438_p2 = por %p437_p1, %p436_p10 }
  0x2d   : > { %p439_p6 = pnand %p438_p2, %p432_p5 }
  0x2f   : > { %442 = shalt.err (!%p439_p6)
}
  0x30   : > { %s443_s4 = scalar_lea.vmem %s666_s22, 128  ;;  %s531_s7 = smov [#allocation7]  }
  0x31   : > { %p444_p12 = scmp.ne.s32.totalorder %s666_s22, %s443_s4  ;;  %s448_s8 = sshll.u32 %s531_s7, 4  ;;  %s449_s8 = int_to_ptr.vmem [resolvable:$false] %s448_s8 }
  0x32   : > { %s450_s14 = scalar_lea.vmem %s449_s8, 256  ;;  %p451_p4 = scmp.lt.s32.totalorder %s666_s22, %s449_s8 }
  0x33   : > { %p446_p0 = pnand %p444_p12, %p430_p13  ;;  %p452_p3 = scmp.lt.s32.totalorder %s450_s14, %s443_s4 }
  0x35   : > { %p447_p9 = pneg %p446_p0  ;;  %p453_p7 = por %p452_p3, %p451_p4 }
  0x37   : > { %p454_p10 = pnand %p453_p7, %p447_p9 }
  0x39   : > { %457 = shalt.err (!%p454_p10)
}
  0x3a   : > { %370 = dma.hbm_to_vmem [thread:$0]  (!%p662_p11), %s658_s23, 128, %s666_s22, %s120_s25  }
  0x3b   : > { %139 = sbr.rel (%p591_p8) target bundleno = 233 (0xe9), region = 28  ;;  %p776_p6 = scmp.eq.s32.totalorder (!%p591_p8), %s572_s13, 0 }
  0x42   : > { %503 = dma.done.wait (%p776_p6), [#allocation6], 16   ;;  %p777_p13 = pmov %p776_p6 }
  0x43   : > { %s700_s19 = sand.u32 1, %s520_s10   ;;  %p778_p4 = scmp.ne.s32.totalorder %s768_s15, 0 }
  0x44   : > { %505 = vsyncadd (%p777_p13), [#allocation6], 4294967280  ;;  %s341_s21 = sshll.u32 %s700_s19, 3  ;;  %s146_s20 = scalar_lea.sflag [#allocation4], %s700_s19 }
  0x45   : > { %s149_s23 = scalar_lea.vmem [#allocation7], %s341_s21 }
  0x46   : > { %507 = dma.done.wait (%p778_p4), %s146_s20, 128  }
  0x47   : > { %509 = vsyncadd (%p778_p4), %s146_s20, 4294967168 }
  0x48   : > { %154 = sfence }
  0x49   : > { %v180_v0 = vld [vmem:[%s149_s23] sm:$0xff]  ;;  %vm181_vm0 = vcmask 64512   ;;  %vm184_vm1 = vcmask 1047616   ;;  %v192_v1 = vlaneseq  ;;  %v532_v2 = vmov 0.0   ;;  %s533_s17 = smov 1   ;;  %s534_s15 = smov 127  }
  0x4a   : > { %182 = vst.msk [vmem:[#allocation2] sm:$0xff] %vm181_vm0, %v180_v0  ;;  %v191_v4 = vrot.slane %v532_v2, 7  ;;  %v220_v9 = vrot.slane %v532_v2, 1  ;;  %s346_s22 = sld [smem:[#allocation3 + $0x4]]  ;;  %s343_s24 = sld [smem:[#allocation3 + $0x1]] }
  0x4b   : > { %185 = vst.msk [vmem:[#allocation2] sm:$0xff] %vm184_vm1, %v532_v2  ;;  %v193_v3 = vshrl.u32 %v192_v1, 7  ;;  %s171_s25 = sld [smem:[#allocation3]]  ;;  %s344_s26 = sld [smem:[#allocation3 + $0x2]] }
  0x4c   : > { %s345_s27 = sld [smem:[#allocation3 + $0x3]]  ;;  %s347_s28 = sld [smem:[#allocation3 + $0x5]] }
  0x4d   : > { %vm194_vm2 = vcmp.lt.s32.totalorder %v193_v3, 1  ;;  %vm221_vm3 = vcmp.lt.s32.totalorder %v193_v3, 7  ;;  %s348_s29 = sld [smem:[#allocation3 + $0x6]]  ;;  %s349_s30 = sld [smem:[#allocation3 + $0x7]] }
  0x4e   : > { %s350_s3 = sld [smem:[#allocation3 + $0x8]]  ;;  %s352_s4 = sshll.u32 %s572_s13, 7 }
  0x4f   : > { %s170_s7 = scalar_lea.vmem [#allocation8], %s341_s21  ;;  %s717_s23 = scalar_lea.hbm %s764_s2, %s352_s4 }
  0x50   : > { %v188_v11 = vstv %s346_s22  ;;  %v201_v12 = vstv %s343_s24  ;;  %s251_s8 = sshll.u32 %s170_s7, 4  ;;  %p779_p9 = scmp.ne.s32.totalorder %s774_s6, 0  ;;  %s719_s8 = int_to_ptr.vmem [resolvable:$true] %s251_s8 }
  0x51   : > { %v198_v13 = vstv %s171_s25  ;;  %v206_v19 = vstv %s344_s26  ;;  %s535_s13 = smov [#allocation8]  }
  0x52   : > { %v186_v5 = vld [vmem:[#allocation2] sm:$0xff]  ;;  %v211_v21 = vstv %s345_s27  ;;  %v216_v24 = vstv %s347_s28  ;;  %s462_s21 = sshll.u32 %s535_s13, 4  ;;  %s463_s21 = int_to_ptr.vmem [resolvable:$false] %s462_s21 }
  0x53   : > { %v190_v6 = vrot.slane %v186_v5, 7  ;;  %209 = vrot.lane.b32.xlu1 %v186_v5, %s533_s17  ;;  %v219_v8 = vrot.slane %v186_v5, 1  ;;  %v189_v15 = vmul.f32 %v188_v11, %v186_v5  ;;  %v225_v27 = vstv %s348_s29  ;;  %s464_s22 = scalar_lea.vmem %s463_s21, 256  ;;  %p465_p1 = scmp.lt.s32.totalorder %s719_s8, %s463_s21 }
  0x54   : > { %v228_v31 = vstv %s349_s30  ;;  %v233_v36 = vstv %s350_s3 }
  0x55   : > { %v195_v7 = vsel %vm194_vm2, %v191_v4, %v190_v6  ;;  %v222_v10 = vsel %vm221_vm3, %v219_v8, %v220_v9 }
  0x56   : > { %196 = vrot.lane.b32.xlu0 %v195_v7, %s533_s17  ;;  %v202_v17 = vmul.f32 %v201_v12, %v195_v7  ;;  %v229_v37 = vmul.f32 %v228_v31, %v222_v10 }
  0x57   : > { %214 = vrot.lane.b32.xlu1 %v186_v5, %s534_s15 }
  0x5a   : > { %204 = vrot.lane.b32.xlu0 %v195_v7, %s534_s15 }
  0x5b   : > { %231 = vrot.lane.b32.xlu1 %v222_v10, %s534_s15  ;;  %s458_s15 = scalar_lea.vmem %s719_s8, 128 }
  0x5c   : > { %p459_p8 = scmp.ne.s32.totalorder %s719_s8, %s458_s15  ;;  %p466_p2 = scmp.lt.s32.totalorder %s464_s22, %s458_s15 }
  0x5e   : > { %223 = vrot.lane.b32.xlu0 %v222_v10, %s533_s17  ;;  %s238_s17 = scalar_lea.sflag [#allocation5], %s700_s19  ;;  %p460_p11 = pnand %p459_p8, %p779_p9 }
  0x5f   : > { %p467_p12 = por %p466_p2, %p465_p1 }
  0x60   : > { %p461_p5 = pneg %p460_p11 }
  0x62   : > { %p468_p0 = pnand %p467_p12, %p461_p5 }
  0xc5   : > { %v210_v14 = vpop.permute.xlu1 %209 }
  0xc6   : > { %v212_v28 = vmul.f32 %v211_v21, %v210_v14 }
  0xc8   : > { %v197_v16 = vpop.permute.xlu0 %196 }
  0xc9   : > { %v199_v18 = vmul.f32 %v198_v13, %v197_v16  ;;  %v215_v23 = vpop.permute.xlu1 %214 }
  0xca   : > { %v217_v30 = vmul.f32 %v216_v24, %v215_v23 }
  0xcb   : > { %v200_v20 = vadd.f32 %v199_v18, %v189_v15 }
  0xcc   : > { %v205_v22 = vpop.permute.xlu0 %204 }
  0xcd   : > { %v203_v25 = vadd.f32 %v202_v17, %v200_v20  ;;  %v207_v26 = vmul.f32 %v206_v19, %v205_v22  ;;  %v232_v35 = vpop.permute.xlu1 %231 }
  0xce   : > { %v234_v40 = vmul.f32 %v233_v36, %v232_v35 }
  0xcf   : > { %v208_v29 = vadd.f32 %v207_v26, %v203_v25 }
  0xd0   : > { %v224_v32 = vpop.permute.xlu0 %223 }
  0xd1   : > { %v213_v33 = vadd.f32 %v212_v28, %v208_v29  ;;  %v226_v34 = vmul.f32 %v225_v27, %v224_v32 }
  0xd3   : > { %v218_v38 = vadd.f32 %v217_v30, %v213_v33 }
  0xd5   : > { %v227_v39 = vadd.f32 %v226_v34, %v218_v38 }
  0xd7   : > { %v230_v41 = vadd.f32 %v229_v37, %v227_v39 }
  0xd9   : > { %v235_v42 = vadd.f32 %v234_v40, %v230_v41 }
  0xdb   : > { %236 = vst.msk [vmem:[%s170_s7] sm:$0xff] %vm181_vm0, %v235_v42 }
  0xdc   : > { %471 = shalt.err (!%p468_p0)
}
  0xdd   : > { %s472_s19 = scalar_lea.hbm %s717_s23, 128  ;;  %s476_s26 = scalar_lea.hbm %s764_s2, 256 }
  0xde   : > { %p473_p3 = scmp.ne.s32.totalorder %s717_s23, %s472_s19  ;;  %p477_p6 = scmp.lt.u32.totalorder %s717_s23, %s764_s2 }
  0xdf   : > { %p478_p13 = scmp.lt.u32.totalorder %s476_s26, %s472_s19  ;;  %p480_p8 = scmp.lt.u32.totalorder %s472_s19, %s717_s23 }
  0xe0   : > { %p474_p7 = pnand %p473_p3, %p779_p9 }
  0xe1   : > { %p479_p4 = por %p478_p13, %p477_p6 }
  0xe2   : > { %p475_p10 = pneg %p474_p7 }
  0xe3   : > { %p481_p11 = por %p480_p8, %p479_p4 }
  0xe5   : > { %p482_p5 = pnand %p481_p11, %p475_p10 }
  0xe7   : > { %485 = shalt.err (!%p482_p5)
}
  0xe8   : > { %361 = dma.vmem_to_hbm [thread:$0]  (%p779_p9), %s719_s8, 128, %s717_s23, %s238_s17  }
  0xe9 PF: > { %s263_s29 = sand.u32 1, %s516_s9   ;;  %p780_p1 = scmp.ne.s32.totalorder %s769_s16, 0 }
  0xea   : > { %p781_p2 = scmp.ge.s32.totalorder %s528_s12, 2  ;;  %s264_s30 = scalar_lea.sflag [#allocation5], %s263_s29 }
  0xec   : > { %p372_p12 = pnand %p781_p2, %p780_p1 }
  0xee   : > { %511 = dma.done.wait (!%p372_p12), %s264_s30, 128  }
  0xef   : > { %513 = vsyncadd (!%p372_p12), %s264_s30, 4294967168  ;;  %p16_p0 = scmp.ge.s32.totalorder %s597_s18, 4   ;;  %s782_s9 = smov %s520_s10 }
  0xf0   : > { %s783_s10 = smov %s524_s11  ;;  %s784_s11 = smov %s637_s5 }
  0xf1   : > { %s785_s12 = smov %s597_s18  ;;  %18 = sbr.rel (!%p16_p0) target bundleno = 6 (0x6), region = 78 }
  0xf8   :  { %269 = vsyncpa [#allocation4], 1 }
  0xf9   :  { %271 = vsyncpa [#allocation4 + $0x1], 1 }
  0xfa   :  { %272 = vsyncpa [#allocation5], 1 }
  0xfb   :  { %274 = vsyncpa [#allocation5 + $0x1], 1 }
  0xfc   :  { %275 = vsyncpa [#allocation6], 1 }
  0xfd   :  { %277 = vsyncpa [#allocation6 + $0x1], 1 }

</bundles_post_ra>
